<compile_context>
chip_gen: v7x
topology: tpu7x:2x2x1
jax: 0.10.0
libtpu: 0.0.40
codegen_flags: <defaults>
</compile_context>

<pallas_src>
import functools

import jax
import jax.numpy as jnp
from jax.experimental import pallas as pl
from jax.experimental.pallas import tpu as pltpu


def _mlp_tanh3_kernel(x_ref, w1_ref, b1_ref, w2_ref, b2_ref,
                      w3_ref, b3_ref, w4_ref, b4_ref, o_ref):
    # Fused 4-layer MLP with tanh activations, all in VMEM / f32.
    # Matmuls go to the MXU; tanh goes to the EUP (separate VLIW slot).
    x = x_ref[...]
    h = jnp.dot(x, w1_ref[...], preferred_element_type=jnp.float32)
    h = jnp.tanh(h + b1_ref[...])                       # (TB,H1p) + (1,H1p)
    h = jnp.dot(h, w2_ref[...], preferred_element_type=jnp.float32)
    h = jnp.tanh(h + b2_ref[...])                       # (TB,H2p) + (1,H2p)
    h = jnp.dot(h, w3_ref[...], preferred_element_type=jnp.float32)
    h = jnp.tanh(h + b3_ref[...])                       # (TB,H2p) + (1,H2p)
    y = jnp.dot(h, w4_ref[...], preferred_element_type=jnp.float32)
    y = y + b4_ref[...]                                 # (TB,O)   + (1,O)
    o_ref[...] = y.astype(o_ref.dtype)


def _round_up(x, m):
    return ((x + m - 1) // m) * m


def _pad2(a, rows, cols):
    return jnp.pad(a, ((0, rows - a.shape[0]), (0, cols - a.shape[1])))


def prepare_params(w1, b1, w2, b2, w3, b3, w4, b4):
    """One-time parameter prep (call at model init, NOT per forward).

    Pads only the *hidden* feature dims (width_1, width_2) up to multiples of
    128 so the intermediate activations are lane-dense.  The input dim d and
    the output dim out_dim are kept at their true sizes (the MXU pads K
    internally; the output store stays at its true width).  Padding is exact:
    tanh(0) = 0 and padded weight rows/cols are zero.
    Weights are stored pre-transposed vs. PyTorch, i.e. (in_features,
    out_features), so the kernel computes x @ w directly.
    """
    LANE = 128
    D, H1 = w1.shape
    H2 = w2.shape[1]
    O = w4.shape[1]
    H1p = _round_up(max(H1, LANE), LANE)
    H2p = _round_up(max(H2, LANE), LANE)

    w1p = _pad2(w1, D, H1p)
    b1p = _pad2(b1.reshape(1, -1), 1, H1p)
    w2p = _pad2(w2, H1p, H2p)
    b2p = _pad2(b2.reshape(1, -1), 1, H2p)
    w3p = _pad2(w3, H2p, H2p)
    b3p = _pad2(b3.reshape(1, -1), 1, H2p)
    w4p = _pad2(w4, H2p, O)
    b4p = b4.reshape(1, -1)
    return (w1p, b1p, w2p, b2p, w3p, b3p, w4p, b4p)


@functools.partial(jax.jit, static_argnames=("tb",))
def dyn_model_net_tanh3(x, params, *, tb=512):
    """DynModelNetTanh3 forward.

    x      : (B, d)
    params : output of `prepare_params` (hidden dims padded to 128 multiples)
    returns (B, out_dim)
    """
    w1p, b1p, w2p, b2p, w3p, b3p, w4p, b4p = params
    B, D = x.shape
    H1p = w1p.shape[1]
    H2p = w2p.shape[1]
    O = w4p.shape[1]

    # Batch tile: split into >= 2 tiles when possible (so the "parallel" grid
    # axis shards across both TensorCores on v7x), but cap rows per tile at
    # `tb` to keep VMEM bounded and let the input pipeline overlap on big B.
    B8 = _round_up(B, 8)
    TB = min(tb, max(8, _round_up(pl.cdiv(B8, 2), 8)))
    Bp = _round_up(B, TB)
    grid = Bp // TB

    # Only the batch rows are (conditionally) padded; feature dims stay true.
    xp = x if Bp == B else jnp.pad(x, ((0, Bp - B), (0, 0)))

    const = lambda i: (0, 0)  # weights/biases resident across the batch grid

    out_p = pl.pallas_call(
        _mlp_tanh3_kernel,
        out_shape=jax.ShapeDtypeStruct((Bp, O), x.dtype),
        grid=(grid,),
        in_specs=[
            pl.BlockSpec((TB, D), lambda i: (i, 0)),    # x streams per tile
            pl.BlockSpec((D, H1p), const),
            pl.BlockSpec((1, H1p), const),
            pl.BlockSpec((H1p, H2p), const),
            pl.BlockSpec((1, H2p), const),
            pl.BlockSpec((H2p, H2p), const),
            pl.BlockSpec((1, H2p), const),
            pl.BlockSpec((H2p, O), const),
            pl.BlockSpec((1, O), const),
        ],
        out_specs=pl.BlockSpec((TB, O), lambda i: (i, 0)),
        compiler_params=pltpu.CompilerParams(
            dimension_semantics=("parallel",)),
    )(xp, w1p, b1p, w2p, b2p, w3p, b3p, w4p, b4p)

    return out_p if Bp == B else out_p[:B]


if __name__ == "__main__":
    # Module hyper-params (d, width_1, width_2, out_dim) — small feature dims
    # as the module implies, with a real batch so tiling is exercised.
    B, D, W1, W2, O = 256, 4, 32, 32, 8

    key = jax.random.PRNGKey(0)
    ks = jax.random.split(key, 9)

    x = jax.random.normal(ks[0], (B, D), dtype=jnp.float32)
    # Deterministic "nn.Linear"-style params, stored pre-transposed (in, out).
    w1 = jax.random.normal(ks[1], (D, W1), dtype=jnp.float32) / jnp.sqrt(D)
    b1 = jax.random.normal(ks[2], (W1,), dtype=jnp.float32) * 0.1
    w2 = jax.random.normal(ks[3], (W1, W2), dtype=jnp.float32) / jnp.sqrt(W1)
    b2 = jax.random.normal(ks[4], (W2,), dtype=jnp.float32) * 0.1
    w3 = jax.random.normal(ks[5], (W2, W2), dtype=jnp.float32) / jnp.sqrt(W2)
    b3 = jax.random.normal(ks[6], (W2,), dtype=jnp.float32) * 0.1
    w4 = jax.random.normal(ks[7], (W2, O), dtype=jnp.float32) / jnp.sqrt(W2)
    b4 = jax.random.normal(ks[8], (O,), dtype=jnp.float32) * 0.1

    # One-time parameter prep (padding hoisted out of the per-call path).
    params = prepare_params(w1, b1, w2, b2, w3, b3, w4, b4)
    params = jax.block_until_ready(params)

    out = dyn_model_net_tanh3(x, params)
    out = jax.block_until_ready(out)

    # Reference check (plain JAX) for forward-pass semantics.
    h = jnp.tanh(x @ w1 + b1)
    h = jnp.tanh(h @ w2 + b2)
    h = jnp.tanh(h @ w3 + b3)
    ref = h @ w4 + b4

    assert out.shape == (B, O)
    assert jnp.allclose(out, ref, atol=1e-4, rtol=1e-4)

    print("KERNEL_OK")
</pallas_src>

<mosaic_0001>
module attributes {stable_mosaic.version = 11 : i64} {
  func.func @_mlp_tanh3_kernel(%arg0: i32, %arg1: memref<128x4xf32, #tpu.memory_space<vmem>>, %arg2: memref<4x128xf32, #tpu.memory_space<vmem>>, %arg3: memref<1x128xf32, #tpu.memory_space<vmem>>, %arg4: memref<128x128xf32, #tpu.memory_space<vmem>>, %arg5: memref<1x128xf32, #tpu.memory_space<vmem>>, %arg6: memref<128x128xf32, #tpu.memory_space<vmem>>, %arg7: memref<1x128xf32, #tpu.memory_space<vmem>>, %arg8: memref<128x8xf32, #tpu.memory_space<vmem>>, %arg9: memref<1x8xf32, #tpu.memory_space<vmem>>, %arg10: memref<128x8xf32, #tpu.memory_space<vmem>>) attributes {dimension_semantics = [#tpu.dimension_semantics<parallel>], iteration_bounds = array<i64: 2>, scalar_prefetch = 0 : i64, scratch_operands = 0 : i64, tpu.core_type = #tpu.core_type<tc>, window_params = [{transform_indices = @transform_0, window_bounds = array<i64: 128, 4>}, {pipeline_mode = #tpu.pipeline_mode<synchronous>, transform_indices = @transform_1, window_bounds = array<i64: 4, 128>}, {pipeline_mode = #tpu.pipeline_mode<synchronous>, transform_indices = @transform_2, window_bounds = array<i64: 1, 128>}, {pipeline_mode = #tpu.pipeline_mode<synchronous>, transform_indices = @transform_3, window_bounds = array<i64: 128, 128>}, {pipeline_mode = #tpu.pipeline_mode<synchronous>, transform_indices = @transform_4, window_bounds = array<i64: 1, 128>}, {pipeline_mode = #tpu.pipeline_mode<synchronous>, transform_indices = @transform_5, window_bounds = array<i64: 128, 128>}, {pipeline_mode = #tpu.pipeline_mode<synchronous>, transform_indices = @transform_6, window_bounds = array<i64: 1, 128>}, {pipeline_mode = #tpu.pipeline_mode<synchronous>, transform_indices = @transform_7, window_bounds = array<i64: 128, 8>}, {pipeline_mode = #tpu.pipeline_mode<synchronous>, transform_indices = @transform_8, window_bounds = array<i64: 1, 8>}, {transform_indices = @transform_9, window_bounds = array<i64: 128, 8>}]} {
    %c0 = arith.constant 0 : index
    %c0_0 = arith.constant 0 : index
    %0 = vector.load %arg1[%c0, %c0_0] : memref<128x4xf32, #tpu.memory_space<vmem>>, vector<128x4xf32>
    %c0_1 = arith.constant 0 : index
    %c0_2 = arith.constant 0 : index
    %1 = vector.load %arg2[%c0_1, %c0_2] : memref<4x128xf32, #tpu.memory_space<vmem>>, vector<4x128xf32>
    %cst = arith.constant dense<0.000000e+00> : vector<128x128xf32>
    %2 = tpu.matmul %0, %1, %cst {dimension_numbers = #tpu.dot_dimension_numbers<[1], [0], [0], [1], [0, 0, 1, 1], [], []>} : vector<128x4xf32>, vector<4x128xf32>, vector<128x128xf32> -> vector<128x128xf32>
    %c0_3 = arith.constant 0 : index
    %c0_4 = arith.constant 0 : index
    %3 = vector.load %arg3[%c0_3, %c0_4] : memref<1x128xf32, #tpu.memory_space<vmem>>, vector<1x128xf32>
    %4 = vector.broadcast %3 : vector<1x128xf32> to vector<128x128xf32>
    %5 = arith.addf %2, %4 : vector<128x128xf32>
    %6 = math.tanh %5 : vector<128x128xf32>
    %c0_5 = arith.constant 0 : index
    %c0_6 = arith.constant 0 : index
    %7 = vector.load %arg4[%c0_5, %c0_6] : memref<128x128xf32, #tpu.memory_space<vmem>>, vector<128x128xf32>
    %cst_7 = arith.constant dense<0.000000e+00> : vector<128x128xf32>
    %8 = tpu.matmul %6, %7, %cst_7 {dimension_numbers = #tpu.dot_dimension_numbers<[1], [0], [0], [1], [0, 0, 1, 1], [], []>} : vector<128x128xf32>, vector<128x128xf32>, vector<128x128xf32> -> vector<128x128xf32>
    %c0_8 = arith.constant 0 : index
    %c0_9 = arith.constant 0 : index
    %9 = vector.load %arg5[%c0_8, %c0_9] : memref<1x128xf32, #tpu.memory_space<vmem>>, vector<1x128xf32>
    %10 = vector.broadcast %9 : vector<1x128xf32> to vector<128x128xf32>
    %11 = arith.addf %8, %10 : vector<128x128xf32>
    %12 = math.tanh %11 : vector<128x128xf32>
    %c0_10 = arith.constant 0 : index
    %c0_11 = arith.constant 0 : index
    %13 = vector.load %arg6[%c0_10, %c0_11] : memref<128x128xf32, #tpu.memory_space<vmem>>, vector<128x128xf32>
    %cst_12 = arith.constant dense<0.000000e+00> : vector<128x128xf32>
    %14 = tpu.matmul %12, %13, %cst_12 {dimension_numbers = #tpu.dot_dimension_numbers<[1], [0], [0], [1], [0, 0, 1, 1], [], []>} : vector<128x128xf32>, vector<128x128xf32>, vector<128x128xf32> -> vector<128x128xf32>
    %c0_13 = arith.constant 0 : index
    %c0_14 = arith.constant 0 : index
    %15 = vector.load %arg7[%c0_13, %c0_14] : memref<1x128xf32, #tpu.memory_space<vmem>>, vector<1x128xf32>
    %16 = vector.broadcast %15 : vector<1x128xf32> to vector<128x128xf32>
    %17 = arith.addf %14, %16 : vector<128x128xf32>
    %18 = math.tanh %17 : vector<128x128xf32>
    %c0_15 = arith.constant 0 : index
    %c0_16 = arith.constant 0 : index
    %19 = vector.load %arg8[%c0_15, %c0_16] : memref<128x8xf32, #tpu.memory_space<vmem>>, vector<128x8xf32>
    %cst_17 = arith.constant dense<0.000000e+00> : vector<128x8xf32>
    %20 = tpu.matmul %18, %19, %cst_17 {dimension_numbers = #tpu.dot_dimension_numbers<[1], [0], [0], [1], [0, 0, 1, 1], [], []>} : vector<128x128xf32>, vector<128x8xf32>, vector<128x8xf32> -> vector<128x8xf32>
    %c0_18 = arith.constant 0 : index
    %c0_19 = arith.constant 0 : index
    %21 = vector.load %arg9[%c0_18, %c0_19] : memref<1x8xf32, #tpu.memory_space<vmem>>, vector<1x8xf32>
    %22 = vector.broadcast %21 : vector<1x8xf32> to vector<128x8xf32>
    %23 = arith.addf %20, %22 : vector<128x8xf32>
    %c0_20 = arith.constant 0 : index
    %c0_21 = arith.constant 0 : index
    %24 = vector.load %arg10[%c0_20, %c0_21] : memref<128x8xf32, #tpu.memory_space<vmem>>, vector<128x8xf32>
    tpu.vector_store %arg10[%c0_20, %c0_21], %23 {strides = array<i32>} : memref<128x8xf32, #tpu.memory_space<vmem>>, vector<128x8xf32>,
    return
  }
  func.func @transform_0(%arg0: i32) -> (i32, i32) {
    %c0_i32 = arith.constant 0 : i32
    %c0_i32_0 = arith.constant 0 : i32
    return %arg0, %c0_i32 : i32, i32
  }
  func.func @transform_1(%arg0: i32) -> (i32, i32) {
    %c0_i32 = arith.constant 0 : i32
    %c0_i32_0 = arith.constant 0 : i32
    %c0_i32_1 = arith.constant 0 : i32
    return %c0_i32, %c0_i32_0 : i32, i32
  }
  func.func @transform_2(%arg0: i32) -> (i32, i32) {
    %c0_i32 = arith.constant 0 : i32
    %c0_i32_0 = arith.constant 0 : i32
    %c0_i32_1 = arith.constant 0 : i32
    return %c0_i32, %c0_i32_0 : i32, i32
  }
  func.func @transform_3(%arg0: i32) -> (i32, i32) {
    %c0_i32 = arith.constant 0 : i32
    %c0_i32_0 = arith.constant 0 : i32
    %c0_i32_1 = arith.constant 0 : i32
    return %c0_i32, %c0_i32_0 : i32, i32
  }
  func.func @transform_4(%arg0: i32) -> (i32, i32) {
    %c0_i32 = arith.constant 0 : i32
    %c0_i32_0 = arith.constant 0 : i32
    %c0_i32_1 = arith.constant 0 : i32
    return %c0_i32, %c0_i32_0 : i32, i32
  }
  func.func @transform_5(%arg0: i32) -> (i32, i32) {
    %c0_i32 = arith.constant 0 : i32
    %c0_i32_0 = arith.constant 0 : i32
    %c0_i32_1 = arith.constant 0 : i32
    return %c0_i32, %c0_i32_0 : i32, i32
  }
  func.func @transform_6(%arg0: i32) -> (i32, i32) {
    %c0_i32 = arith.constant 0 : i32
    %c0_i32_0 = arith.constant 0 : i32
    %c0_i32_1 = arith.constant 0 : i32
    return %c0_i32, %c0_i32_0 : i32, i32
  }
  func.func @transform_7(%arg0: i32) -> (i32, i32) {
    %c0_i32 = arith.constant 0 : i32
    %c0_i32_0 = arith.constant 0 : i32
    %c0_i32_1 = arith.constant 0 : i32
    return %c0_i32, %c0_i32_0 : i32, i32
  }
  func.func @transform_8(%arg0: i32) -> (i32, i32) {
    %c0_i32 = arith.constant 0 : i32
    %c0_i32_0 = arith.constant 0 : i32
    %c0_i32_1 = arith.constant 0 : i32
    return %c0_i32, %c0_i32_0 : i32, i32
  }
  func.func @transform_9(%arg0: i32) -> (i32, i32) {
    %c0_i32 = arith.constant 0 : i32
    %c0_i32_0 = arith.constant 0 : i32
    return %arg0, %c0_i32 : i32, i32
  }
}

</mosaic_0001>

<bundles_post_ra>
// kernel: dyn_model_net_tanh3.1
= control target key start
LH: loop header
LB: loop body
LE: loop exit
PB: predicated region body
PF: predicated region fallthrough
CT: control target
= control target key end

     0   :  { %s1796_s30 = smov 0   ;;  %s2113_s0 = inlined_call_operand.vmem [shape: f32[256,4], index: 0, kind: input, shape index: {}]   ;;  %s2114_s1 = inlined_call_operand.vmem [shape: f32[4,128], index: 1, kind: input, shape index: {}]   ;;  %s2115_s2 = inlined_call_operand.vmem [shape: f32[1,128], index: 2, kind: input, shape index: {}]   ;;  %s2116_s3 = inlined_call_operand.vmem [shape: f32[128,128], index: 3, kind: input, shape index: {}]   ;;  %s2117_s4 = inlined_call_operand.vmem [shape: f32[1,128], index: 4, kind: input, shape index: {}]   ;;  %s2118_s5 = inlined_call_operand.vmem [shape: f32[128,128], index: 5, kind: input, shape index: {}]   ;;  %s2119_s6 = inlined_call_operand.vmem [shape: f32[1,128], index: 6, kind: input, shape index: {}]   ;;  %s2120_s7 = inlined_call_operand.vmem [shape: f32[128,8], index: 7, kind: input, shape index: {}]   ;;  %s2121_s8 = inlined_call_operand.vmem [shape: f32[1,8], index: 8, kind: input, shape index: {}]   ;;  %s2122_s9 = inlined_call_operand.vmem [shape: f32[256,8], index: 9, kind: output, shape index: {}]  }
   0x1 LB: > { %s1183_s10 = sadd.s32 4294967295, %s1744_s30   ;;  %p1187_p0 = scmp.ge.s32.totalorder %s1744_s30, 1  ;;  %s1744_s30 = sphi %s1796_s30, %s19_s30  }
   0x2   : > { %p288_p1 = scmp.lt.s32.totalorder %s1744_s30, 3 }
   0x4   : > { %p289_p2 = pnand %p1187_p0, %p288_p1 }
   0x5   : > { %v352_v0 = vld [vmem:[%s2114_s1] sm:$0xf] (!%p289_p2)  ;;  %vm409_vm0 = vcmask (!%p289_p2), 1043456   ;;  %s1188_s13 = sshll.u32 (!%p289_p2), %s1183_s10, 4  ;;  %v575_v2 = vld [vmem:[%s2116_s3 + $0x8] sm:$0xff] (!%p289_p2)  ;;  %v576_v3 = vld [vmem:[%s2116_s3 + $0x10] sm:$0xff] (!%p289_p2) }
   0x6   : > { %292 = sbr.rel (%p289_p2) target bundleno = 943 (0x3af), region = 56  ;;  %v574_v1 = vld [vmem:[%s2116_s3] sm:$0xff] (!%p289_p2)  ;;  %1328 = vmatprep.subr.msk.mxu0 (!%p289_p2), %vm409_vm0, %v352_v0  ;;  %p325_p3 = scmp.lt.s32.totalorder (!%p289_p2), %s1188_s13, 31  ;;  %v577_v4 = vld [vmem:[%s2116_s3 + $0x18] sm:$0xff] (!%p289_p2)  ;;  %v579_v8 = vld [vmem:[%s2116_s3 + $0x28] sm:$0xff] (!%p289_p2)  ;;  %vm360_vm1 = vcmask (!%p289_p2), 31744  }
   0x7   : > { %1329 = vmatpush3.msk.msra.mxu0 (!%p289_p2), %vm409_vm0, %v352_v0  ;;  %v1522_v5 = vpack.c.bf16 (!%p289_p2), %v575_v2, %v574_v1  ;;  %v1526_v6 = vpack.c.bf16 (!%p289_p2), %v577_v4, %v576_v3  ;;  %v578_v7 = vld [vmem:[%s2116_s3 + $0x20] sm:$0xff] (!%p289_p2)  ;;  %v580_v10 = vld [vmem:[%s2116_s3 + $0x30] sm:$0xff] (!%p289_p2)  ;;  %v581_v11 = vld [vmem:[%s2116_s3 + $0x38] sm:$0xff] (!%p289_p2)  ;;  %vm1110_vm2 = vcmask (!%p289_p2), 64512  }
   0x8   : > { %v1530_v9 = vpack.c.bf16 (!%p289_p2), %v579_v8, %v578_v7  ;;  %v1534_v16 = vpack.c.bf16 (!%p289_p2), %v581_v11, %v580_v10  ;;  %v582_v29 = vld [vmem:[%s2116_s3 + $0x40] sm:$0xff] (!%p289_p2)  ;;  %v583_v30 = vld [vmem:[%s2116_s3 + $0x48] sm:$0xff] (!%p289_p2)  ;;  %v584_v32 = vld [vmem:[%s2116_s3 + $0x50] sm:$0xff] (!%p289_p2) }
   0x9   : > { %1523 = vmatprep.subr.bf16.mxu1 (!%p289_p2), %v1522_v5  ;;  %v1538_v31 = vpack.c.bf16 (!%p289_p2), %v583_v30, %v582_v29  ;;  %v585_v33 = vld [vmem:[%s2116_s3 + $0x58] sm:$0xff] (!%p289_p2)  ;;  %v586_v35 = vld [vmem:[%s2116_s3 + $0x60] sm:$0xff] (!%p289_p2)  ;;  %v587_v36 = vld [vmem:[%s2116_s3 + $0x68] sm:$0xff] (!%p289_p2) }
   0xa   : > { %1525 = vmatpush3.bf16.msra.mxu1 (!%p289_p2), %v1522_v5  ;;  %v1542_v34 = vpack.c.bf16 (!%p289_p2), %v585_v33, %v584_v32  ;;  %v1546_v37 = vpack.c.bf16 (!%p289_p2), %v587_v36, %v586_v35  ;;  %v588_v38 = vld [vmem:[%s2116_s3 + $0x70] sm:$0xff] (!%p289_p2)  ;;  %v589_v39 = vld [vmem:[%s2116_s3 + $0x78] sm:$0xff] (!%p289_p2)  ;;  %v758_v41 = vld [vmem:[%s2118_s5] sm:$0xff] (!%p289_p2) }
   0xb   : > { %1527 = vmatprep.subr.bf16.mxu1 (!%p289_p2), %v1526_v6  ;;  %v1550_v40 = vpack.c.bf16 (!%p289_p2), %v589_v39, %v588_v38  ;;  %v759_v42 = vld [vmem:[%s2118_s5 + $0x8] sm:$0xff] (!%p289_p2)  ;;  %v760_v43 = vld [vmem:[%s2118_s5 + $0x10] sm:$0xff] (!%p289_p2)  ;;  %v761_v45 = vld [vmem:[%s2118_s5 + $0x18] sm:$0xff] (!%p289_p2) }
   0xc   : > { %v1554_v44 = vpack.c.bf16 (!%p289_p2), %v759_v42, %v758_v41  ;;  %v1558_v46 = vpack.c.bf16 (!%p289_p2), %v761_v45, %v760_v43  ;;  %v762_v47 = vld [vmem:[%s2118_s5 + $0x20] sm:$0xff] (!%p289_p2)  ;;  %v763_v48 = vld [vmem:[%s2118_s5 + $0x28] sm:$0xff] (!%p289_p2)  ;;  %v764_v50 = vld [vmem:[%s2118_s5 + $0x30] sm:$0xff] (!%p289_p2) }
   0xd   : > { %s2124_s13 = smov (!%p325_p3, %s1188_s13), 31  ;;  %v1562_v49 = vpack.c.bf16 %v763_v48, %v762_v47  ;;  %v765_v51 = vld [vmem:[%s2118_s5 + $0x38] sm:$0xff]  ;;  %v766_v53 = vld [vmem:[%s2118_s5 + $0x40] sm:$0xff]  ;;  %v767_v54 = vld [vmem:[%s2118_s5 + $0x48] sm:$0xff] }
   0xe   : > { %s1189_s26 = sshll.u32 %s2124_s13, 3  ;;  %1529 = vmatpush3.bf16.msra.mxu1 %v1526_v6  ;;  %1555 = vmatprep.subr.bf16.mxu0 %v1554_v44  ;;  %v1566_v52 = vpack.c.bf16 %v765_v51, %v764_v50  ;;  %v1570_v55 = vpack.c.bf16 %v767_v54, %v766_v53  ;;  %v1930_v56 = vld [vmem:[%s2115_s2] ss:$0 sm:$0xff]  ;;  %v768_v41 = vld [vmem:[%s2118_s5 + $0x50] sm:$0xff]  ;;  %v769_v42 = vld [vmem:[%s2118_s5 + $0x58] sm:$0xff] }
   0xf   : > { %s1833_s29 = scalar_lea.vmem %s2113_s0, %s1189_s26  ;;  %1531 = vmatprep.subr.bf16.mxu1 %v1530_v9  ;;  %v1574_v43 = vpack.c.bf16 %v769_v42, %v768_v41  ;;  %v771_v45 = vld [vmem:[%s2118_s5 + $0x68] sm:$0xff]  ;;  %v772_v47 = vld [vmem:[%s2118_s5 + $0x70] sm:$0xff]  ;;  %v773_v48 = vld [vmem:[%s2118_s5 + $0x78] sm:$0xff]  ;;  %s2076_s15 = scalar_lea.vmem %s2122_s9, %s1189_s26 }
  0x10   : > { %v336_v12 = vld [vmem:[%s1833_s29] sm:$0xff]  ;;  %v337_v13 = vld [vmem:[%s1833_s29 + $0x8] sm:$0xff]  ;;  %v338_v14 = vld [vmem:[%s1833_s29 + $0x10] sm:$0xff] }
  0x11   : > { %1330 = vmatprep.mubr.msk.f32.mxu0 %vm360_vm1, %v336_v12  ;;  %v339_v15 = vld [vmem:[%s1833_s29 + $0x18] sm:$0xff]  ;;  %v340_v17 = vld [vmem:[%s1833_s29 + $0x20] sm:$0xff]  ;;  %v341_v18 = vld [vmem:[%s1833_s29 + $0x28] sm:$0xff] }
  0x12   : > { %1331 = vmatmul.mubr.msk.f32.vlgmr.msra.gmra.mrb[0].mxu0 %vm360_vm1, %v337_v13  ;;  %1533 = vmatpush3.bf16.msra.mxu1 %v1530_v9  ;;  %v342_v19 = vld [vmem:[%s1833_s29 + $0x30] sm:$0xff]  ;;  %v343_v20 = vld [vmem:[%s1833_s29 + $0x38] sm:$0xff]  ;;  %v344_v21 = vld [vmem:[%s1833_s29 + $0x40] sm:$0xff] }
  0x13   : > { %1333 = vmatprep.mubr.msk.f32.mxu0 %vm360_vm1, %v338_v14  ;;  %1535 = vmatprep.subr.bf16.mxu1 %v1534_v16  ;;  %v345_v22 = vld [vmem:[%s1833_s29 + $0x48] sm:$0xff]  ;;  %v346_v23 = vld [vmem:[%s1833_s29 + $0x50] sm:$0xff]  ;;  %v347_v24 = vld [vmem:[%s1833_s29 + $0x58] sm:$0xff] }
  0x14   : > { %v348_v25 = vld [vmem:[%s1833_s29 + $0x60] sm:$0xff]  ;;  %v349_v26 = vld [vmem:[%s1833_s29 + $0x68] sm:$0xff]  ;;  %v350_v27 = vld [vmem:[%s1833_s29 + $0x70] sm:$0xff]  ;;  %1557 = vmatpush3.bf16.msra.mxu0 %v1554_v44 }
  0x15   : > { %v351_v28 = vld [vmem:[%s1833_s29 + $0x78] sm:$0xff]  ;;  %1559 = vmatprep.subr.bf16.mxu0 %v1558_v46  ;;  %v770_v44 = vld [vmem:[%s2118_s5 + $0x60] sm:$0xff]  ;;  %v943_v51 = vld [vmem:[%s2120_s7 + $0x8] sm:$0xff] }
  0x16   : > { %1334 = vmatmul.mubr.msk.f32.gmra.mrb[2].mxu0 %vm360_vm1, %v339_v15  ;;  %1537 = vmatpush3.bf16.msra.mxu1 %v1534_v16  ;;  %v942_v50 = vld [vmem:[%s2120_s7] sm:$0xff]  ;;  %v945_v54 = vld [vmem:[%s2120_s7 + $0x18] sm:$0xff] }
  0x17   : > { %1336 = vmatprep.mubr.msk.f32.mxu0 %vm360_vm1, %v340_v17  ;;  %1539 = vmatprep.subr.bf16.mxu1 %v1538_v31  ;;  %v1586_v53 = vpack.c.bf16 %v943_v51, %v942_v50  ;;  %v952_v50 = vld [vmem:[%s2120_s7 + $0x50] sm:$0xff]  ;;  %v953_v51 = vld [vmem:[%s2120_s7 + $0x58] sm:$0xff] }
  0x18   : > { %1561 = vmatpush3.bf16.msra.mxu0 %v1558_v46  ;;  %v1578_v46 = vpack.c.bf16 %v771_v45, %v770_v44 }
  0x19   : > { %1563 = vmatprep.subr.bf16.mxu0 %v1562_v49 }
  0x1a   : > { %1337 = vmatmul.mubr.msk.f32.gmra.mrb[4].mxu0 %vm360_vm1, %v341_v18  ;;  %1541 = vmatpush3.bf16.msra.mxu1 %v1538_v31 }
  0x1b   : > { %1339 = vmatprep.mubr.msk.f32.mxu0 %vm360_vm1, %v342_v19  ;;  %1543 = vmatprep.subr.bf16.mxu1 %v1542_v34 }
  0x1c   : > { %1565 = vmatpush3.bf16.msra.mxu0 %v1562_v49  ;;  %v1582_v49 = vpack.c.bf16 %v773_v48, %v772_v47  ;;  %v950_v47 = vld [vmem:[%s2120_s7 + $0x40] sm:$0xff]  ;;  %v951_v48 = vld [vmem:[%s2120_s7 + $0x48] sm:$0xff] }
  0x1d   : > { %1567 = vmatprep.subr.bf16.mxu0 %v1566_v52 }
  0x1e   : > { %1340 = vmatmul.mubr.msk.f32.gmra.mrb[6].mxu0 %vm360_vm1, %v343_v20  ;;  %1545 = vmatpush3.bf16.msra.mxu1 %v1542_v34 }
  0x1f   : > { %1342 = vmatprep.mubr.msk.f32.mxu0 %vm360_vm1, %v344_v21  ;;  %1547 = vmatprep.subr.bf16.mxu1 %v1546_v37 }
  0x20   : > { %1569 = vmatpush3.bf16.msra.mxu0 %v1566_v52  ;;  %v944_v52 = vld [vmem:[%s2120_s7 + $0x10] sm:$0xff] }
  0x21   : > { %1571 = vmatprep.subr.bf16.mxu0 %v1570_v55 }
  0x22   : > { %1343 = vmatmul.mubr.msk.f32.gmra.mrb[8].mxu0 %vm360_vm1, %v345_v22  ;;  %1549 = vmatpush3.bf16.msra.mxu1 %v1546_v37 }
  0x23   : > { %1345 = vmatprep.mubr.msk.f32.mxu0 %vm360_vm1, %v346_v23  ;;  %1551 = vmatprep.subr.bf16.mxu1 %v1550_v40 }
  0x24   : > { %1573 = vmatpush3.bf16.msra.mxu0 %v1570_v55  ;;  %v1590_v55 = vpack.c.bf16 %v945_v54, %v944_v52  ;;  %v1606_v52 = vpack.c.bf16 %v953_v51, %v952_v50  ;;  %v955_v54 = vld [vmem:[%s2120_s7 + $0x68] sm:$0xff] }
  0x25   : > { %1575 = vmatprep.subr.bf16.mxu0 %v1574_v43 }
  0x26   : > { %1346 = vmatmul.mubr.msk.f32.gmra.mrb[10].mxu0 %vm360_vm1, %v347_v24  ;;  %1553 = vmatpush3.bf16.msra.mxu1 %v1550_v40 }
  0x27   : > { %1348 = vmatprep.mubr.msk.f32.mxu0 %vm360_vm1, %v348_v25  ;;  %1618 = vmatprep.subr.bf16.mxu1 %v1586_v53 }
  0x28   : > { %1577 = vmatpush3.bf16.msra.mxu0 %v1574_v43 }
  0x29   : > { %1579 = vmatprep.subr.bf16.mxu0 %v1578_v46 }
  0x2a   : > { %1349 = vmatmul.mubr.msk.f32.gmra.mrb[12].mxu0 %vm360_vm1, %v349_v26 }
  0x2b   : > { %1351 = vmatprep.mubr.msk.f32.mxu0 %vm360_vm1, %v350_v27 }
  0x2c   : > { %1581 = vmatpush3.bf16.msra.mxu0 %v1578_v46 }
  0x2d   : > { %1583 = vmatprep.subr.bf16.mxu0 %v1582_v49 }
  0x2e   : > { %1352 = vmatmul.mubr.msk.f32.gmra.mrb[14].mxu0 %vm360_vm1, %v351_v28 }
  0x30   : > { %1585 = vmatpush3.bf16.msra.mxu0 %v1582_v49  ;;  %v1602_v49 = vpack.c.bf16 %v951_v48, %v950_v47 }
  0x31   : > { %1587 = vmatprep.subr.bf16.mxu0 %v1586_v53 }
  0xe5   : > { %v1332_v57 = vpop.f32.mrb[0].mxu0 }
  0xe6   : > { %v485_v58 = vadd.f32 %v1332_v57, %v1930_v56  ;;  %v479_v59 = vpop.f32.mrb[1].mxu0  ;;  %v947_v57 = vld [vmem:[%s2120_s7 + $0x28] sm:$0xff] }
  0xe7   : > { %v480_v60 = vadd.f32 %v1930_v56, %v479_v59  ;;  %v948_v59 = vld [vmem:[%s2120_s7 + $0x30] sm:$0xff] }
  0xe9   : > { %1642 = vtanh.f32 %v480_v60  ;;  %v1335_v61 = vpop.f32.mrb[2].mxu0  ;;  %v949_v60 = vld [vmem:[%s2120_s7 + $0x38] sm:$0xff] }
  0xea   : > { %1644 = vtanh.f32 %v485_v58  ;;  %v495_v62 = vadd.f32 %v1335_v61, %v1930_v56  ;;  %v489_v63 = vpop.f32.mrb[3].mxu0  ;;  %v1993_v61 = vpack.c.bf16 %v949_v60, %v948_v59  ;;  %v2050_v59 = vld [vmem:[%s2119_s6] ss:$0 sm:$0xff] }
  0xeb   : > { %v490_v0 = vadd.f32 %v1930_v56, %v489_v63 }
  0xed   : > { %1646 = vtanh.f32 %v490_v0  ;;  %v1338_v1 = vpop.f32.mrb[4].mxu0 }
  0xee   : > { %1648 = vtanh.f32 %v495_v62  ;;  %v505_v2 = vadd.f32 %v1338_v1, %v1930_v56  ;;  %v499_v3 = vpop.f32.mrb[5].mxu0  ;;  %v2001_v62 = vld [vmem:[%s2117_s4] ss:$0 sm:$0xff] }
  0xef   : > { %v500_v4 = vadd.f32 %v1930_v56, %v499_v3 }
  0xf1   : > { %1650 = vtanh.f32 %v500_v4  ;;  %v1341_v5 = vpop.f32.mrb[6].mxu0 }
  0xf2   : > { %1652 = vtanh.f32 %v505_v2  ;;  %v515_v6 = vadd.f32 %v1341_v5, %v1930_v56  ;;  %v509_v7 = vpop.f32.mrb[7].mxu0 }
  0xf3   : > { %v1643_v8 = vpop.eup %1642  ;;  %v510_v9 = vadd.f32 %v1930_v56, %v509_v7 }
  0xf4   : > { %v1645_v10 = vpop.eup %1644  ;;  %1386 = vmatprep.mubr.f32.mxu1 %v1643_v8 }
  0xf5   : > { %1654 = vtanh.f32 %v510_v9  ;;  %v1344_v11 = vpop.f32.mrb[8].mxu0  ;;  %1387 = vmatmul.mubr.f32.vlgmr.msra.gmra.mrb[0].mxu1 %v1645_v10 }
  0xf6   : > { %1656 = vtanh.f32 %v515_v6  ;;  %v525_v12 = vadd.f32 %v1344_v11, %v1930_v56  ;;  %v519_v13 = vpop.f32.mrb[9].mxu0  ;;  %1626 = vmatpush3.bf16.msra.mxu1 %v1586_v53 }
  0xf7   : > { %v1647_v14 = vpop.eup %1646  ;;  %v520_v15 = vadd.f32 %v1930_v56, %v519_v13  ;;  %1619 = vmatprep.subr.bf16.mxu1 %v1590_v55 }
  0xf8   : > { %v1649_v16 = vpop.eup %1648  ;;  %1389 = vmatprep.mubr.f32.mxu1 %v1647_v14 }
  0xf9   : > { %1658 = vtanh.f32 %v520_v15  ;;  %v1347_v17 = vpop.f32.mrb[10].mxu0  ;;  %1390 = vmatmul.mubr.f32.gmra.mrb[2].mxu1 %v1649_v16 }
  0xfa   : > { %1660 = vtanh.f32 %v525_v12  ;;  %v535_v18 = vadd.f32 %v1347_v17, %v1930_v56  ;;  %v529_v19 = vpop.f32.mrb[11].mxu0  ;;  %1627 = vmatpush3.bf16.msra.mxu1 %v1590_v55 }
  0xfb   : > { %v1651_v20 = vpop.eup %1650  ;;  %v530_v21 = vadd.f32 %v1930_v56, %v529_v19 }
  0xfc   : > { %v1653_v22 = vpop.eup %1652  ;;  %1392 = vmatprep.mubr.f32.mxu1 %v1651_v20 }
  0xfd   : > { %1662 = vtanh.f32 %v530_v21  ;;  %v1350_v23 = vpop.f32.mrb[12].mxu0  ;;  %1393 = vmatmul.mubr.f32.gmra.mrb[4].mxu1 %v1653_v22 }
  0xfe   : > { %1664 = vtanh.f32 %v535_v18  ;;  %v545_v24 = vadd.f32 %v1350_v23, %v1930_v56  ;;  %v539_v25 = vpop.f32.mrb[13].mxu0 }
  0xff   : > { %v1655_v26 = vpop.eup %1654  ;;  %v540_v27 = vadd.f32 %v1930_v56, %v539_v25 }
 0x100   : > { %v1657_v28 = vpop.eup %1656  ;;  %1395 = vmatprep.mubr.f32.mxu1 %v1655_v26 }
 0x101   : > { %1666 = vtanh.f32 %v540_v27  ;;  %v1353_v29 = vpop.f32.mrb[14].mxu0  ;;  %1396 = vmatmul.mubr.f32.gmra.mrb[6].mxu1 %v1657_v28 }
 0x102   : > { %1668 = vtanh.f32 %v545_v24  ;;  %v555_v30 = vadd.f32 %v1353_v29, %v1930_v56  ;;  %v549_v31 = vpop.f32.mrb[15].mxu0 }
 0x103   : > { %v1659_v32 = vpop.eup %1658  ;;  %v550_v33 = vadd.f32 %v1930_v56, %v549_v31  ;;  %v946_v56 = vld [vmem:[%s2120_s7 + $0x20] sm:$0xff] }
 0x104   : > { %v1661_v34 = vpop.eup %1660  ;;  %1398 = vmatprep.mubr.f32.mxu1 %v1659_v32  ;;  %v1984_v58 = vpack.c.bf16 %v947_v57, %v946_v56  ;;  %v956_v56 = vld [vmem:[%s2120_s7 + $0x70] sm:$0xff]  ;;  %v957_v57 = vld [vmem:[%s2120_s7 + $0x78] sm:$0xff] }
 0x105   : > { %1670 = vtanh.f32 %v550_v33  ;;  %1399 = vmatmul.mubr.f32.gmra.mrb[8].mxu1 %v1661_v34 }
 0x106   : > { %1672 = vtanh.f32 %v555_v30  ;;  %1620 = vmatprep.subr.bf16.mxu1 %v1984_v58 }
 0x107   : > { %v1663_v35 = vpop.eup %1662  ;;  %1628 = vmatpush3.bf16.msra.mxu1 %v1984_v58 }
 0x108   : > { %v1665_v36 = vpop.eup %1664  ;;  %1401 = vmatprep.mubr.f32.mxu1 %v1663_v35  ;;  %1621 = vmatprep.subr.bf16.mxu1 %v1993_v61 }
 0x109   : > { %1402 = vmatmul.mubr.f32.gmra.mrb[10].mxu1 %v1665_v36 }
 0x10b   : > { %v1667_v37 = vpop.eup %1666  ;;  %1629 = vmatpush3.bf16.msra.mxu1 %v1993_v61 }
 0x10c   : > { %v1669_v38 = vpop.eup %1668  ;;  %1404 = vmatprep.mubr.f32.mxu1 %v1667_v37  ;;  %1622 = vmatprep.subr.bf16.mxu1 %v1602_v49 }
 0x10d   : > { %1405 = vmatmul.mubr.f32.gmra.mrb[12].mxu1 %v1669_v38 }
 0x10f   : > { %v1671_v39 = vpop.eup %1670  ;;  %1630 = vmatpush3.bf16.msra.mxu1 %v1602_v49 }
 0x110   : > { %v1673_v40 = vpop.eup %1672  ;;  %1407 = vmatprep.mubr.f32.mxu1 %v1671_v39  ;;  %1623 = vmatprep.subr.bf16.mxu1 %v1606_v52 }
 0x111   : > { %1408 = vmatmul.mubr.f32.gmra.mrb[14].mxu1 %v1673_v40 }
 0x113   : > { %1631 = vmatpush3.bf16.msra.mxu1 %v1606_v52 }
 0x1c8   : > { %v1388_v63 = vpop.f32.mrb[0].mxu1 }
 0x1c9   : > { %v669_v0 = vadd.f32 %v1388_v63, %v2001_v62  ;;  %v663_v1 = vpop.f32.mrb[1].mxu1 }
 0x1ca   : > { %v664_v2 = vadd.f32 %v2001_v62, %v663_v1 }
 0x1cc   : > { %1674 = vtanh.f32 %v664_v2  ;;  %v1391_v3 = vpop.f32.mrb[2].mxu1 }
 0x1cd   : > { %1676 = vtanh.f32 %v669_v0  ;;  %v679_v4 = vadd.f32 %v1391_v3, %v2001_v62  ;;  %v673_v5 = vpop.f32.mrb[3].mxu1 }
 0x1ce   : > { %v674_v6 = vadd.f32 %v2001_v62, %v673_v5 }
 0x1d0   : > { %1678 = vtanh.f32 %v674_v6  ;;  %v1394_v7 = vpop.f32.mrb[4].mxu1 }
 0x1d1   : > { %1680 = vtanh.f32 %v679_v4  ;;  %v689_v8 = vadd.f32 %v1394_v7, %v2001_v62  ;;  %v683_v9 = vpop.f32.mrb[5].mxu1 }
 0x1d2   : > { %v684_v10 = vadd.f32 %v2001_v62, %v683_v9 }
 0x1d4   : > { %1682 = vtanh.f32 %v684_v10  ;;  %v1397_v11 = vpop.f32.mrb[6].mxu1 }
 0x1d5   : > { %1684 = vtanh.f32 %v689_v8  ;;  %v699_v12 = vadd.f32 %v1397_v11, %v2001_v62  ;;  %v693_v13 = vpop.f32.mrb[7].mxu1 }
 0x1d6   : > { %v1675_v14 = vpop.eup %1674  ;;  %v694_v15 = vadd.f32 %v2001_v62, %v693_v13 }
 0x1d7   : > { %v1677_v16 = vpop.eup %1676  ;;  %1442 = vmatprep.mubr.f32.mxu0 %v1675_v14 }
 0x1d8   : > { %1686 = vtanh.f32 %v694_v15  ;;  %v1400_v17 = vpop.f32.mrb[8].mxu1  ;;  %1443 = vmatmul.mubr.f32.vlgmr.msra.gmra.mrb[16].mxu0 %v1677_v16 }
 0x1d9   : > { %1688 = vtanh.f32 %v699_v12  ;;  %v709_v18 = vadd.f32 %v1400_v17, %v2001_v62  ;;  %v703_v19 = vpop.f32.mrb[9].mxu1  ;;  %1589 = vmatpush3.bf16.msra.mxu0 %v1586_v53  ;;  %v954_v53 = vld [vmem:[%s2120_s7 + $0x60] sm:$0xff] }
 0x1da   : > { %v1679_v20 = vpop.eup %1678  ;;  %v704_v21 = vadd.f32 %v2001_v62, %v703_v19  ;;  %1591 = vmatprep.subr.bf16.mxu0 %v1590_v55 }
 0x1db   : > { %v1681_v22 = vpop.eup %1680  ;;  %1445 = vmatprep.mubr.f32.mxu0 %v1679_v20 }
 0x1dc   : > { %1690 = vtanh.f32 %v704_v21  ;;  %v1403_v23 = vpop.f32.mrb[10].mxu1  ;;  %1446 = vmatmul.mubr.f32.gmra.mrb[18].mxu0 %v1681_v22 }
 0x1dd   : > { %1692 = vtanh.f32 %v709_v18  ;;  %v719_v24 = vadd.f32 %v1403_v23, %v2001_v62  ;;  %v713_v25 = vpop.f32.mrb[11].mxu1  ;;  %1593 = vmatpush3.bf16.msra.mxu0 %v1590_v55  ;;  %v1610_v55 = vpack.c.bf16 %v955_v54, %v954_v53 }
 0x1de   : > { %v1683_v26 = vpop.eup %1682  ;;  %v714_v27 = vadd.f32 %v2001_v62, %v713_v25  ;;  %1595 = vmatprep.subr.bf16.mxu0 %v1984_v58 }
 0x1df   : > { %v1685_v28 = vpop.eup %1684  ;;  %1448 = vmatprep.mubr.f32.mxu0 %v1683_v26  ;;  %1624 = vmatprep.subr.bf16.mxu1 %v1610_v55 }
 0x1e0   : > { %1694 = vtanh.f32 %v714_v27  ;;  %v1406_v29 = vpop.f32.mrb[12].mxu1  ;;  %1449 = vmatmul.mubr.f32.gmra.mrb[20].mxu0 %v1685_v28  ;;  %1632 = vmatpush3.bf16.msra.mxu1 %v1610_v55 }
 0x1e1   : > { %1696 = vtanh.f32 %v719_v24  ;;  %v729_v30 = vadd.f32 %v1406_v29, %v2001_v62  ;;  %v723_v31 = vpop.f32.mrb[13].mxu1  ;;  %1597 = vmatpush3.bf16.msra.mxu0 %v1984_v58  ;;  %v1614_v58 = vpack.c.bf16 %v957_v57, %v956_v56 }
 0x1e2   : > { %v1687_v32 = vpop.eup %1686  ;;  %v724_v33 = vadd.f32 %v2001_v62, %v723_v31  ;;  %1599 = vmatprep.subr.bf16.mxu0 %v1993_v61 }
 0x1e3   : > { %v1689_v34 = vpop.eup %1688  ;;  %1451 = vmatprep.mubr.f32.mxu0 %v1687_v32  ;;  %1625 = vmatprep.subr.bf16.mxu1 %v1614_v58 }
 0x1e4   : > { %1698 = vtanh.f32 %v724_v33  ;;  %v1409_v35 = vpop.f32.mrb[14].mxu1  ;;  %1452 = vmatmul.mubr.f32.gmra.mrb[22].mxu0 %v1689_v34  ;;  %1633 = vmatpush3.bf16.msra.mxu1 %v1614_v58 }
 0x1e5   : > { %1700 = vtanh.f32 %v729_v30  ;;  %v739_v36 = vadd.f32 %v1409_v35, %v2001_v62  ;;  %v733_v37 = vpop.f32.mrb[15].mxu1  ;;  %1601 = vmatpush3.bf16.msra.mxu0 %v1993_v61 }
 0x1e6   : > { %v1691_v38 = vpop.eup %1690  ;;  %v734_v39 = vadd.f32 %v2001_v62, %v733_v37  ;;  %1603 = vmatprep.subr.bf16.mxu0 %v1602_v49 }
 0x1e7   : > { %v1693_v40 = vpop.eup %1692  ;;  %1454 = vmatprep.mubr.f32.mxu0 %v1691_v38 }
 0x1e8   : > { %1702 = vtanh.f32 %v734_v39  ;;  %1455 = vmatmul.mubr.f32.gmra.mrb[24].mxu0 %v1693_v40 }
 0x1e9   : > { %1704 = vtanh.f32 %v739_v36  ;;  %1605 = vmatpush3.bf16.msra.mxu0 %v1602_v49 }
 0x1ea   : > { %v1695_v41 = vpop.eup %1694  ;;  %1607 = vmatprep.subr.bf16.mxu0 %v1606_v52 }
 0x1eb   : > { %v1697_v42 = vpop.eup %1696  ;;  %1457 = vmatprep.mubr.f32.mxu0 %v1695_v41 }
 0x1ec   : > { %1458 = vmatmul.mubr.f32.gmra.mrb[26].mxu0 %v1697_v42 }
 0x1ed   : > { %1609 = vmatpush3.bf16.msra.mxu0 %v1606_v52 }
 0x1ee   : > { %v1699_v43 = vpop.eup %1698  ;;  %1611 = vmatprep.subr.bf16.mxu0 %v1610_v55 }
 0x1ef   : > { %v1701_v44 = vpop.eup %1700  ;;  %1460 = vmatprep.mubr.f32.mxu0 %v1699_v43 }
 0x1f0   : > { %1461 = vmatmul.mubr.f32.gmra.mrb[28].mxu0 %v1701_v44  ;;  %v1212_v44 = vld [vmem:[%s2121_s8] ss:$0 sm:$0xff] }
 0x1f1   : > { %1613 = vmatpush3.bf16.msra.mxu0 %v1610_v55 }
 0x1f2   : > { %v1703_v45 = vpop.eup %1702  ;;  %1615 = vmatprep.subr.bf16.mxu0 %v1614_v58 }
 0x1f3   : > { %v1705_v46 = vpop.eup %1704  ;;  %1463 = vmatprep.mubr.f32.mxu0 %v1703_v45 }
 0x1f4   : > { %1464 = vmatmul.mubr.f32.gmra.mrb[30].mxu0 %v1705_v46 }
 0x1f5   : > { %1617 = vmatpush3.bf16.msra.mxu0 %v1614_v58 }
 0x2ab   : > { %v1444_v60 = vpop.f32.mrb[16].mxu0 }
 0x2ac   : > { %v853_v61 = vadd.f32 %v1444_v60, %v2050_v59  ;;  %v847_v62 = vpop.f32.mrb[17].mxu0 }
 0x2ad   : > { %v848_v63 = vadd.f32 %v2050_v59, %v847_v62 }
 0x2af   : > { %1706 = vtanh.f32 %v848_v63  ;;  %v1447_v0 = vpop.f32.mrb[18].mxu0 }
 0x2b0   : > { %1708 = vtanh.f32 %v853_v61  ;;  %v863_v1 = vadd.f32 %v1447_v0, %v2050_v59  ;;  %v857_v2 = vpop.f32.mrb[19].mxu0 }
 0x2b1   : > { %v858_v3 = vadd.f32 %v2050_v59, %v857_v2 }
 0x2b3   : > { %1710 = vtanh.f32 %v858_v3  ;;  %v1450_v4 = vpop.f32.mrb[20].mxu0 }
 0x2b4   : > { %1712 = vtanh.f32 %v863_v1  ;;  %v873_v5 = vadd.f32 %v1450_v4, %v2050_v59  ;;  %v867_v6 = vpop.f32.mrb[21].mxu0 }
 0x2b5   : > { %v868_v7 = vadd.f32 %v2050_v59, %v867_v6 }
 0x2b7   : > { %1714 = vtanh.f32 %v868_v7  ;;  %v1453_v8 = vpop.f32.mrb[22].mxu0 }
 0x2b8   : > { %1716 = vtanh.f32 %v873_v5  ;;  %v883_v9 = vadd.f32 %v1453_v8, %v2050_v59  ;;  %v877_v10 = vpop.f32.mrb[23].mxu0 }
 0x2b9   : > { %v1707_v11 = vpop.eup %1706  ;;  %v878_v12 = vadd.f32 %v2050_v59, %v877_v10 }
 0x2ba   : > { %v1709_v13 = vpop.eup %1708  ;;  %1498 = vmatprep.mubr.f32.mxu0 %v1707_v11 }
 0x2bb   : > { %1718 = vtanh.f32 %v878_v12  ;;  %v1456_v14 = vpop.f32.mrb[24].mxu0  ;;  %1499 = vmatmul.mubr.f32.vlgmr.msra.gmra.mrb[32].mxu0 %v1709_v13 }
 0x2bc   : > { %1720 = vtanh.f32 %v883_v9  ;;  %v893_v15 = vadd.f32 %v1456_v14, %v2050_v59  ;;  %v887_v16 = vpop.f32.mrb[25].mxu0 }
 0x2bd   : > { %v1711_v17 = vpop.eup %1710  ;;  %v888_v18 = vadd.f32 %v2050_v59, %v887_v16 }
 0x2be   : > { %v1713_v19 = vpop.eup %1712  ;;  %1501 = vmatprep.mubr.f32.mxu0 %v1711_v17 }
 0x2bf   : > { %1722 = vtanh.f32 %v888_v18  ;;  %v1459_v20 = vpop.f32.mrb[26].mxu0  ;;  %1502 = vmatmul.mubr.f32.gmra.mrb[34].mxu0 %v1713_v19 }
 0x2c0   : > { %1724 = vtanh.f32 %v893_v15  ;;  %v903_v21 = vadd.f32 %v1459_v20, %v2050_v59  ;;  %v897_v22 = vpop.f32.mrb[27].mxu0 }
 0x2c1   : > { %v1715_v23 = vpop.eup %1714  ;;  %v898_v24 = vadd.f32 %v2050_v59, %v897_v22 }
 0x2c2   : > { %v1717_v25 = vpop.eup %1716  ;;  %1504 = vmatprep.mubr.f32.mxu0 %v1715_v23 }
 0x2c3   : > { %1726 = vtanh.f32 %v898_v24  ;;  %v1462_v26 = vpop.f32.mrb[28].mxu0  ;;  %1505 = vmatmul.mubr.f32.gmra.mrb[36].mxu0 %v1717_v25 }
 0x2c4   : > { %1728 = vtanh.f32 %v903_v21  ;;  %v913_v27 = vadd.f32 %v1462_v26, %v2050_v59  ;;  %v907_v28 = vpop.f32.mrb[29].mxu0 }
 0x2c5   : > { %v1719_v29 = vpop.eup %1718  ;;  %v908_v30 = vadd.f32 %v2050_v59, %v907_v28 }
 0x2c6   : > { %v1721_v31 = vpop.eup %1720  ;;  %1507 = vmatprep.mubr.f32.mxu1 %v1719_v29 }
 0x2c7   : > { %1730 = vtanh.f32 %v908_v30  ;;  %v1465_v32 = vpop.f32.mrb[30].mxu0  ;;  %1508 = vmatmul.mubr.f32.vlgmr.msra.gmra.mrb[16].mxu1 %v1721_v31 }
 0x2c8   : > { %1732 = vtanh.f32 %v913_v27  ;;  %v923_v33 = vadd.f32 %v1465_v32, %v2050_v59  ;;  %v917_v34 = vpop.f32.mrb[31].mxu0 }
 0x2c9   : > { %v1723_v35 = vpop.eup %1722  ;;  %v918_v36 = vadd.f32 %v2050_v59, %v917_v34 }
 0x2ca   : > { %v1725_v37 = vpop.eup %1724  ;;  %1510 = vmatprep.mubr.f32.mxu1 %v1723_v35 }
 0x2cb   : > { %1734 = vtanh.f32 %v918_v36  ;;  %1511 = vmatmul.mubr.f32.gmra.mrb[18].mxu1 %v1725_v37 }
 0x2cc   : > { %1736 = vtanh.f32 %v923_v33 }
 0x2cd   : > { %v1727_v38 = vpop.eup %1726 }
 0x2ce   : > { %v1729_v39 = vpop.eup %1728  ;;  %1513 = vmatprep.mubr.f32.mxu1 %v1727_v38 }
 0x2cf   : > { %1514 = vmatmul.mubr.f32.gmra.mrb[20].mxu1 %v1729_v39 }
 0x2d1   : > { %v1731_v40 = vpop.eup %1730 }
 0x2d2   : > { %v1733_v41 = vpop.eup %1732  ;;  %1516 = vmatprep.mubr.f32.mxu1 %v1731_v40 }
 0x2d3   : > { %1517 = vmatmul.mubr.f32.gmra.mrb[22].mxu1 %v1733_v41 }
 0x2d5   : > { %v1735_v42 = vpop.eup %1734 }
 0x2d6   : > { %v1737_v43 = vpop.eup %1736  ;;  %1519 = vmatprep.mubr.f32.mxu1 %v1735_v42 }
 0x2d7   : > { %1520 = vmatmul.mubr.f32.gmra.mrb[24].mxu1 %v1737_v43 }
 0x38e   : > { %v1500_v45 = vpop.f32.mrb[32].mxu0 }
 0x38f   : > { %v1037_v46 = vadd.f32 %v1500_v45, %v1212_v44  ;;  %v1031_v47 = vpop.f32.mrb[33].mxu0 }
 0x390   : > { %v1032_v48 = vadd.f32 %v1212_v44, %v1031_v47 }
 0x391   : > { %1112 = vst.msk [vmem:[%s2076_s15 + $0x8] sm:$0xff] %vm1110_vm2, %v1037_v46 }
 0x392   : > { %1111 = vst.msk [vmem:[%s2076_s15] sm:$0xff] %vm1110_vm2, %v1032_v48  ;;  %v1503_v49 = vpop.f32.mrb[34].mxu0 }
 0x393   : > { %v1047_v50 = vadd.f32 %v1503_v49, %v1212_v44  ;;  %v1041_v51 = vpop.f32.mrb[35].mxu0 }
 0x394   : > { %v1042_v52 = vadd.f32 %v1212_v44, %v1041_v51 }
 0x395   : > { %1114 = vst.msk [vmem:[%s2076_s15 + $0x18] sm:$0xff] %vm1110_vm2, %v1047_v50 }
 0x396   : > { %1113 = vst.msk [vmem:[%s2076_s15 + $0x10] sm:$0xff] %vm1110_vm2, %v1042_v52  ;;  %v1506_v53 = vpop.f32.mrb[36].mxu0 }
 0x397   : > { %v1057_v54 = vadd.f32 %v1506_v53, %v1212_v44  ;;  %v1051_v55 = vpop.f32.mrb[37].mxu0 }
 0x398   : > { %v1052_v56 = vadd.f32 %v1212_v44, %v1051_v55 }
 0x399   : > { %1116 = vst.msk [vmem:[%s2076_s15 + $0x28] sm:$0xff] %vm1110_vm2, %v1057_v54 }
 0x39a   : > { %1115 = vst.msk [vmem:[%s2076_s15 + $0x20] sm:$0xff] %vm1110_vm2, %v1052_v56  ;;  %v1509_v57 = vpop.f32.mrb[16].mxu1 }
 0x39b   : > { %v1067_v58 = vadd.f32 %v1509_v57, %v1212_v44  ;;  %v1061_v59 = vpop.f32.mrb[17].mxu1 }
 0x39c   : > { %v1062_v60 = vadd.f32 %v1212_v44, %v1061_v59 }
 0x39d   : > { %1118 = vst.msk [vmem:[%s2076_s15 + $0x38] sm:$0xff] %vm1110_vm2, %v1067_v58 }
 0x39e   : > { %1117 = vst.msk [vmem:[%s2076_s15 + $0x30] sm:$0xff] %vm1110_vm2, %v1062_v60  ;;  %v1512_v61 = vpop.f32.mrb[18].mxu1 }
 0x39f   : > { %v1077_v62 = vadd.f32 %v1512_v61, %v1212_v44  ;;  %v1071_v63 = vpop.f32.mrb[19].mxu1 }
 0x3a0   : > { %v1072_v0 = vadd.f32 %v1212_v44, %v1071_v63 }
 0x3a1   : > { %1120 = vst.msk [vmem:[%s2076_s15 + $0x48] sm:$0xff] %vm1110_vm2, %v1077_v62 }
 0x3a2   : > { %1119 = vst.msk [vmem:[%s2076_s15 + $0x40] sm:$0xff] %vm1110_vm2, %v1072_v0  ;;  %v1515_v1 = vpop.f32.mrb[20].mxu1 }
 0x3a3   : > { %v1087_v2 = vadd.f32 %v1515_v1, %v1212_v44  ;;  %v1081_v3 = vpop.f32.mrb[21].mxu1 }
 0x3a4   : > { %v1082_v4 = vadd.f32 %v1212_v44, %v1081_v3 }
 0x3a5   : > { %1122 = vst.msk [vmem:[%s2076_s15 + $0x58] sm:$0xff] %vm1110_vm2, %v1087_v2 }
 0x3a6   : > { %1121 = vst.msk [vmem:[%s2076_s15 + $0x50] sm:$0xff] %vm1110_vm2, %v1082_v4  ;;  %v1518_v5 = vpop.f32.mrb[22].mxu1 }
 0x3a7   : > { %v1097_v6 = vadd.f32 %v1518_v5, %v1212_v44  ;;  %v1091_v7 = vpop.f32.mrb[23].mxu1 }
 0x3a8   : > { %v1092_v8 = vadd.f32 %v1212_v44, %v1091_v7 }
 0x3a9   : > { %1124 = vst.msk [vmem:[%s2076_s15 + $0x68] sm:$0xff] %vm1110_vm2, %v1097_v6 }
 0x3aa   : > { %1123 = vst.msk [vmem:[%s2076_s15 + $0x60] sm:$0xff] %vm1110_vm2, %v1092_v8  ;;  %v1521_v9 = vpop.f32.mrb[24].mxu1 }
 0x3ab   : > { %v1107_v10 = vadd.f32 %v1521_v9, %v1212_v44  ;;  %v1101_v11 = vpop.f32.mrb[25].mxu1 }
 0x3ac   : > { %v1102_v12 = vadd.f32 %v1212_v44, %v1101_v11 }
 0x3ad   : > { %1126 = vst.msk [vmem:[%s2076_s15 + $0x78] sm:$0xff] %vm1110_vm2, %v1107_v10 }
 0x3ae   : > { %1125 = vst.msk [vmem:[%s2076_s15 + $0x70] sm:$0xff] %vm1110_vm2, %v1102_v12 }
 0x3af PF: > { %s19_s30 = sadd.s32 1, %s1744_s30  }
 0x3b0   : > { %p16_p4 = scmp.ge.s32.totalorder %s19_s30, 4  }
 0x3b2   :  { %18 = sbr.rel (!%p16_p4) target bundleno = 1 (0x1), region = 86 }

</bundles_post_ra>
